<compile_context>
chip_gen: v5e
topology: v5e:2x2
jax: 0.10.0
libtpu: 0.0.40
codegen_flags: <defaults>
</compile_context>

<pallas_src>
import math
from collections.abc import Iterable

import jax
import jax.numpy as jnp
import numpy as np
from jax.experimental import pallas as pl
from jax.experimental.pallas import tpu as pltpu

_TARGET_BLOCK_BYTES = 1 << 20   # ~1 MiB x-block; ~4-6 MiB VMEM with 2x buffering


# ------------------------------- kernels ---------------------------------- #
# Row-tiled path: x viewed as (tokens, H); one pad flag per token (row).

def _rows_simple_kernel(x_ref, pad_ref, mask_ref, o_ref):
    # x: (TR, H); pad: (TR, 1) f32 {0,1}; mask: (1, H) in x.dtype
    x = x_ref[...]
    pad = pad_ref[...] > 0.5
    o_ref[...] = jnp.where(pad, mask_ref[...], x)


def _rows_highlight_kernel(x_ref, pad_ref, mask_ref, mask0_ref, o_ref):
    x = x_ref[...]
    pad = pad_ref[...] > 0.5
    o_ref[...] = jnp.where(pad, x * mask0_ref[...] + mask_ref[...], x)


# Lane-dense path: x viewed as (R, LANE_W) with LANE_W = G*H a multiple of 128.
# pad: (TR, G) per-token flags; expand: (G, LANE_W) one-hot map token -> its H
# lanes.  pad @ expand yields the per-element flag on the MXU (essentially free
# for this memory-bound kernel) and keeps all loads/stores lane-dense.

def _dense_simple_kernel(x_ref, pad_ref, expand_ref, mask_ref, o_ref):
    x = x_ref[...]
    pad_e = jnp.dot(pad_ref[...], expand_ref[...],
                    preferred_element_type=jnp.float32)
    o_ref[...] = jnp.where(pad_e > 0.5, mask_ref[...], x)


def _dense_highlight_kernel(x_ref, pad_ref, expand_ref, mask_ref, mask0_ref,
                            o_ref):
    x = x_ref[...]
    pad_e = jnp.dot(pad_ref[...], expand_ref[...],
                    preferred_element_type=jnp.float32)
    o_ref[...] = jnp.where(pad_e > 0.5, x * mask0_ref[...] + mask_ref[...], x)


# ------------------------------- wrapper ----------------------------------- #

class MaskingPallas:
    """JAX/Pallas equivalent of junky.layers.Masking (forward)."""

    def __init__(self, input_size, mask=float('-inf'),
                 indices_to_highlight=-1, highlighting_mask=1,
                 batch_first=False):
        if indices_to_highlight is not None and \
                not isinstance(indices_to_highlight, Iterable):
            indices_to_highlight = [indices_to_highlight]
        self.input_size = input_size
        self.batch_first = batch_first

        output_mask = np.full((input_size,), mask, dtype=np.float32)
        output_mask0 = None
        if indices_to_highlight is not None:
            if highlighting_mask is None:
                output_mask0 = np.zeros((input_size,), dtype=np.float32)
                for idx in indices_to_highlight:
                    output_mask0[idx] = 1.0
                    output_mask[idx] = 0.0
            else:
                for idx in indices_to_highlight:
                    output_mask[idx] = highlighting_mask

        self._mask_np = output_mask        # (H,)
        self._mask0_np = output_mask0      # (H,) or None

    def __call__(self, x, lens):
        if self.batch_first:
            B, S, H = x.shape
        else:
            S, B, H = x.shape
        assert H == self.input_size
        dtype = x.dtype
        itemsize = np.dtype(dtype).itemsize
        lens = jnp.asarray(lens, dtype=jnp.int32)

        # Per-token pad flag, laid out in the row-major token order of x.
        seq = jnp.arange(S, dtype=jnp.int32)
        if self.batch_first:
            pad_tok = seq[None, :] >= lens[:, None]        # (B, S): t = b*S + s
        else:
            pad_tok = seq[:, None] >= lens[None, :]        # (S, B): t = s*B + b
        pad_tok = pad_tok.reshape(-1).astype(jnp.float32)  # (T,)
        T = B * S
        N = T * H

        mask = jnp.asarray(self._mask_np, dtype=dtype)                    # (H,)
        mask0 = (None if self._mask0_np is None
                 else jnp.asarray(self._mask0_np, dtype=dtype))           # (H,)

        # ---- choose the 2D view ------------------------------------------ #
        use_dense = False
        lane_w = H
        if H % 128 != 0:
            base = (H * 128) // math.gcd(H, 128)           # lcm(H, 128)
            if base <= 4096 and N % base == 0 and (N // base) >= 8:
                use_dense = True
                lane_w = base
                while (lane_w * 2 <= 1024 and N % (lane_w * 2) == 0
                       and N // (lane_w * 2) >= 8):
                    lane_w *= 2

        if use_dense:
            G = lane_w // H                 # tokens per lane-row
            R = N // lane_w                 # lane-rows
            x2 = x.reshape(R, lane_w)
            pad2 = pad_tok.reshape(R, G)
            reps = lane_w // H
            mask_l = jnp.tile(mask, reps)[None, :]                         # (1, lane_w)
            mask0_l = None if mask0 is None else jnp.tile(mask0, reps)[None, :]
            # One-hot expansion matrix: token g -> lanes [g*H, (g+1)*H).
            tok_of_lane = jnp.arange(lane_w, dtype=jnp.int32) // H
            expand = (tok_of_lane[None, :] ==
                      jnp.arange(G, dtype=jnp.int32)[:, None]
                      ).astype(jnp.float32)                                # (G, lane_w)
        else:
            G = 1
            R = T
            x2 = x.reshape(T, H)
            pad2 = pad_tok.reshape(T, 1)
            mask_l = mask[None, :]
            mask0_l = None if mask0 is None else mask0[None, :]
            expand = None

        # ---- row-tile size (VMEM-aware, generation-safe) ------------------ #
        target_rows = max(1, _TARGET_BLOCK_BYTES // (lane_w * itemsize))
        if target_rows >= R:
            tr = R
        else:
            tr = max(8, (target_rows // 8) * 8)
        grid = (pl.cdiv(R, tr),)

        x_spec = pl.BlockSpec((tr, lane_w), lambda i: (i, 0))
        out_spec = pl.BlockSpec((tr, lane_w), lambda i: (i, 0))
        vec_spec = pl.BlockSpec((1, lane_w), lambda i: (0, 0))

        if use_dense:
            pad_spec = pl.BlockSpec((tr, G), lambda i: (i, 0))
            exp_spec = pl.BlockSpec((G, lane_w), lambda i: (0, 0))
            if mask0_l is None:
                kernel = _dense_simple_kernel
                operands = (x2, pad2, expand, mask_l)
                in_specs = [x_spec, pad_spec, exp_spec, vec_spec]
            else:
                kernel = _dense_highlight_kernel
                operands = (x2, pad2, expand, mask_l, mask0_l)
                in_specs = [x_spec, pad_spec, exp_spec, vec_spec, vec_spec]
        else:
            pad_spec = pl.BlockSpec((tr, 1), lambda i: (i, 0))
            if mask0_l is None:
                kernel = _rows_simple_kernel
                operands = (x2, pad2, mask_l)
                in_specs = [x_spec, pad_spec, vec_spec]
            else:
                kernel = _rows_highlight_kernel
                operands = (x2, pad2, mask_l, mask0_l)
                in_specs = [x_spec, pad_spec, vec_spec, vec_spec]

        out2 = pl.pallas_call(
            kernel,
            out_shape=jax.ShapeDtypeStruct((R, lane_w), dtype),
            grid=grid,
            in_specs=in_specs,
            out_specs=out_spec,
            compiler_params=pltpu.CompilerParams(
                dimension_semantics=("parallel",)),
        )(*operands)

        return out2.reshape(x.shape)


# ------------------------------ reference ---------------------------------- #

def _reference(module, x, lens):
    """Pure-JAX reference of the torch forward."""
    bf = module.batch_first
    xb = x if bf else jnp.transpose(x, (1, 0, 2))          # (B, S, H)
    B, S, H = xb.shape
    lens = jnp.asarray(lens, dtype=jnp.int32)
    pad = (jnp.arange(S)[None, :] >= lens[:, None])[:, :, None]   # (B, S, 1)
    mask = jnp.asarray(module._mask_np, dtype=xb.dtype)
    if module._mask0_np is None:
        out = jnp.where(pad, mask[None, None, :], xb)
    else:
        mask0 = jnp.asarray(module._mask0_np, dtype=xb.dtype)
        out = jnp.where(pad, xb * mask0[None, None, :] + mask[None, None, :], xb)
    return out if bf else jnp.transpose(out, (1, 0, 2))


def _same(a, b):
    a = np.asarray(a)
    b = np.asarray(b)
    return bool(np.all((a == b) | (np.isnan(a) & np.isnan(b))))


# -------------------------------- main ------------------------------------- #

if __name__ == "__main__":
    key = jax.random.PRNGKey(0)

    # Case 1: defaults (mask=-inf, highlight last feature with value 1),
    #         batch_first=True, lane-dense path (H=32 not 128-aligned).
    B, S, H = 4, 64, 32
    x = jax.random.normal(key, (B, S, H), dtype=jnp.float32)
    lens = jnp.array([0, 17, 64, 5], dtype=jnp.int32)
    m1 = MaskingPallas(H, batch_first=True)
    out1 = jax.block_until_ready(m1(x, lens))
    assert _same(out1, _reference(m1, x, lens))

    # Case 2: highlighting_mask=None path, batch_first=False (seq, batch, H),
    #         lane-dense path, no wrapper transposes.
    x_sbh = jnp.transpose(x, (1, 0, 2))
    m2 = MaskingPallas(H, mask=float('-inf'), indices_to_highlight=[0, -1],
                       highlighting_mask=None, batch_first=False)
    out2 = jax.block_until_ready(m2(x_sbh, lens))
    assert _same(out2, _reference(m2, x_sbh, lens))

    # Case 3: odd feature size (H=12) -> generic row-tiled fallback, simple path.
    B3, S3, H3 = 2, 5, 12
    x3 = jax.random.normal(jax.random.PRNGKey(1), (B3, S3, H3), dtype=jnp.float32)
    lens3 = jnp.array([2, 5], dtype=jnp.int32)
    m3 = MaskingPallas(H3, batch_first=True)
    out3 = jax.block_until_ready(m3(x3, lens3))
    assert _same(out3, _reference(m3, x3, lens3))

    # Case 4: odd feature size + seq-first + highlighting_mask=None ->
    #         row-tiled fallback, highlight path.
    S4, B4, H4 = 7, 3, 20
    x4 = jax.random.normal(jax.random.PRNGKey(2), (S4, B4, H4), dtype=jnp.float32)
    lens4 = jnp.array([7, 0, 3], dtype=jnp.int32)
    m4 = MaskingPallas(H4, indices_to_highlight=[2, -3],
                       highlighting_mask=None, batch_first=False)
    out4 = jax.block_until_ready(m4(x4, lens4))
    assert _same(out4, _reference(m4, x4, lens4))

    print("KERNEL_OK")
</pallas_src>

<mosaic_0001>
module attributes {stable_mosaic.version = 11 : i64} {
  func.func @_dense_simple_kernel(%arg0: i32, %arg1: memref<8x1024xf32, #tpu.memory_space<vmem>>, %arg2: memref<8x32xf32, #tpu.memory_space<vmem>>, %arg3: memref<32x1024xf32, #tpu.memory_space<vmem>>, %arg4: memref<1x1024xf32, #tpu.memory_space<vmem>>, %arg5: memref<8x1024xf32, #tpu.memory_space<vmem>>) attributes {dimension_semantics = [#tpu.dimension_semantics<parallel>], iteration_bounds = array<i64: 1>, scalar_prefetch = 0 : i64, scratch_operands = 0 : i64, tpu.core_type = #tpu.core_type<tc>, window_params = [{transform_indices = @transform_0, window_bounds = array<i64: 8, 1024>}, {transform_indices = @transform_1, window_bounds = array<i64: 8, 32>}, {pipeline_mode = #tpu.pipeline_mode<synchronous>, transform_indices = @transform_2, window_bounds = array<i64: 32, 1024>}, {pipeline_mode = #tpu.pipeline_mode<synchronous>, transform_indices = @transform_3, window_bounds = array<i64: 1, 1024>}, {transform_indices = @transform_4, window_bounds = array<i64: 8, 1024>}]} {
    %c0 = arith.constant 0 : index
    %c0_0 = arith.constant 0 : index
    %0 = vector.load %arg1[%c0, %c0_0] : memref<8x1024xf32, #tpu.memory_space<vmem>>, vector<8x1024xf32>
    %c0_1 = arith.constant 0 : index
    %c0_2 = arith.constant 0 : index
    %1 = vector.load %arg2[%c0_1, %c0_2] : memref<8x32xf32, #tpu.memory_space<vmem>>, vector<8x32xf32>
    %c0_3 = arith.constant 0 : index
    %c0_4 = arith.constant 0 : index
    %2 = vector.load %arg3[%c0_3, %c0_4] : memref<32x1024xf32, #tpu.memory_space<vmem>>, vector<32x1024xf32>
    %cst = arith.constant dense<0.000000e+00> : vector<8x1024xf32>
    %3 = tpu.matmul %1, %2, %cst {dimension_numbers = #tpu.dot_dimension_numbers<[1], [0], [0], [1], [0, 0, 1, 1], [], []>} : vector<8x32xf32>, vector<32x1024xf32>, vector<8x1024xf32> -> vector<8x1024xf32>
    %cst_5 = arith.constant 5.000000e-01 : f32
    %4 = vector.broadcast %cst_5 : f32 to vector<8x1024xf32>
    %5 = arith.cmpf ogt, %3, %4 : vector<8x1024xf32>
    %c0_6 = arith.constant 0 : index
    %c0_7 = arith.constant 0 : index
    %6 = vector.load %arg4[%c0_6, %c0_7] : memref<1x1024xf32, #tpu.memory_space<vmem>>, vector<1x1024xf32>
    %7 = vector.shape_cast %6 : vector<1x1024xf32> to vector<1x1024xf32>
    %8 = vector.broadcast %7 : vector<1x1024xf32> to vector<8x1024xf32>
    %9 = arith.select %5, %8, %0 : vector<8x1024xi1>, vector<8x1024xf32>
    %c0_8 = arith.constant 0 : index
    %c0_9 = arith.constant 0 : index
    %10 = vector.load %arg5[%c0_8, %c0_9] : memref<8x1024xf32, #tpu.memory_space<vmem>>, vector<8x1024xf32>
    tpu.vector_store %arg5[%c0_8, %c0_9], %9 {strides = array<i32>} : memref<8x1024xf32, #tpu.memory_space<vmem>>, vector<8x1024xf32>,
    return
  }
  func.func @transform_0(%arg0: i32) -> (i32, i32) {
    %c0_i32 = arith.constant 0 : i32
    %c0_i32_0 = arith.constant 0 : i32
    return %arg0, %c0_i32 : i32, i32
  }
  func.func @transform_1(%arg0: i32) -> (i32, i32) {
    %c0_i32 = arith.constant 0 : i32
    %c0_i32_0 = arith.constant 0 : i32
    return %arg0, %c0_i32 : i32, i32
  }
  func.func @transform_2(%arg0: i32) -> (i32, i32) {
    %c0_i32 = arith.constant 0 : i32
    %c0_i32_0 = arith.constant 0 : i32
    %c0_i32_1 = arith.constant 0 : i32
    return %c0_i32, %c0_i32_0 : i32, i32
  }
  func.func @transform_3(%arg0: i32) -> (i32, i32) {
    %c0_i32 = arith.constant 0 : i32
    %c0_i32_0 = arith.constant 0 : i32
    %c0_i32_1 = arith.constant 0 : i32
    return %c0_i32, %c0_i32_0 : i32, i32
  }
  func.func @transform_4(%arg0: i32) -> (i32, i32) {
    %c0_i32 = arith.constant 0 : i32
    %c0_i32_0 = arith.constant 0 : i32
    return %arg0, %c0_i32 : i32, i32
  }
}

</mosaic_0001>

<bundles_post_ra>
// kernel: tpu_custom_call.1
= control target key start
LH: loop header
LB: loop body
LE: loop exit
PB: predicated region body
PF: predicated region fallthrough
CT: control target
= control target key end

     0   :  { %9 = vsyncpa [#allocation3], 0  ;;  %s539_s0 = inlined_call_operand.hbm [shape: f32[8,1024], index: 0, kind: input, shape index: {}]   ;;  %s540_s1 = inlined_call_operand.hbm [shape: f32[8,32], index: 1, kind: input, shape index: {}]   ;;  %s541_s2 = inlined_call_operand.hbm [shape: f32[32,1024], index: 2, kind: input, shape index: {}]   ;;  %s542_s3 = inlined_call_operand.hbm [shape: f32[1,1024], index: 3, kind: input, shape index: {}]   ;;  %s543_s4 = inlined_call_operand.hbm [shape: f32[8,1024], index: 4, kind: output, shape index: {}]  }
   0x1   :  { %10 = vsyncpa [#allocation6], 0 }
   0x2   :  { %11 = vsyncpa [#allocation9], 0  ;;  %s29_s17 = sshll.u32 %s540_s1, 4  ;;  %s30_s17 = int_to_ptr.hbm [resolvable:$true] %s29_s17 }
   0x3   :  { %12 = vsyncpa [#allocation4], 0  ;;  %s484_s18 = smov [#allocation5]   ;;  %s18_s22 = sshll.u32 %s539_s0, 4  ;;  %s19_s22 = int_to_ptr.hbm [resolvable:$true] %s18_s22 }
   0x4   :  { %s31_s19 = sshll.u32 %s484_s18, 4  ;;  %s485_s23 = smov [#allocation2]   ;;  %s32_s19 = int_to_ptr.vmem [resolvable:$true] %s31_s19 }
   0x5   :  { %34 = dma.hbm_to_vmem [thread:$0]  %s30_s17, 128, %s32_s19, [#allocation6]  }
   0x6   :  { %s20_s24 = sshll.u32 %s485_s23, 4  ;;  %s39_s27 = sshll.u32 %s541_s2, 4  ;;  %s21_s24 = int_to_ptr.vmem [resolvable:$true] %s20_s24  ;;  %s40_s27 = int_to_ptr.hbm [resolvable:$true] %s39_s27 }
   0x7   :  { %23 = dma.hbm_to_vmem [thread:$0]  %s19_s22, 1024, %s21_s24, [#allocation3]  }
   0x8   :  { %s486_s1 = smov [#allocation7]   ;;  %s53_s5 = sshll.u32 %s542_s3, 4  ;;  %s54_s5 = int_to_ptr.hbm [resolvable:$true] %s53_s5 }
   0x9   :  { %s41_s28 = sshll.u32 %s486_s1, 4  ;;  %s487_s6 = smov 1024   ;;  %s42_s28 = int_to_ptr.vmem [resolvable:$true] %s41_s28 }
   0xa   :  { %s488_s0 = smov 64   ;;  %s489_s7 = smov [#allocation8]  }
   0xb   :  { %47 = dma.hbm_to_vmem [thread:$0]  %s40_s27, 4096, %s42_s28, [#allocation6], %s487_s6, %s487_s6, %s488_s0  }
   0xc   :  { %s55_s8 = sshll.u32 %s489_s7, 4  ;;  %s56_s8 = int_to_ptr.vmem [resolvable:$true] %s55_s8 }
   0xd   :  { %58 = dma.hbm_to_vmem [thread:$0]  %s54_s5, 128, %s56_s8, [#allocation9]  }
   0xe   :  { %476 = dma.done.wait [#allocation3], 1024  }
   0xf   :  { %477 = vsyncadd [#allocation3], 4294966272 }
  0x10   :  { %478 = dma.done.wait [#allocation6], 4224  }
  0x11   :  { %479 = vsyncadd [#allocation6], 4294963072 }
  0x12   :  { %480 = dma.done.wait [#allocation9], 128  }
  0x13   :  { %481 = vsyncadd [#allocation9], 4294967168  ;;  %v110_v0 = vld [vmem:[#allocation7 + $0xd0] sm:$0xff]  ;;  %v111_v1 = vld [vmem:[#allocation7 + $0xd8] sm:$0xff]  ;;  %vm116_vm0 = vcmask 261120   ;;  %s490_s2 = smov [#allocation10]  }
  0x14   :  { %v102_v2 = vld [vmem:[#allocation7 + $0x90] sm:$0xff]  ;;  %172 = vmatpush.msra.mxu2 %v110_v0  ;;  %192 = vmatpush.msra.mxu3 %v111_v1  ;;  %v103_v3 = vld [vmem:[#allocation7 + $0x98] sm:$0xff]  ;;  %v108_v6 = vld [vmem:[#allocation7 + $0xc0] sm:$0xff]  ;;  %s327_s3 = sshll.u32 %s490_s2, 4  ;;  %s329_s11 = sshll.u32 %s543_s4, 4  ;;  %s328_s3 = int_to_ptr.vmem [resolvable:$true] %s327_s3  ;;  %s330_s11 = int_to_ptr.hbm [resolvable:$true] %s329_s11 }
  0x15   :  { %v94_v4 = vld [vmem:[#allocation7 + $0x50] sm:$0xff]  ;;  %v95_v5 = vld [vmem:[#allocation7 + $0x58] sm:$0xff]  ;;  %v109_v7 = vld [vmem:[#allocation7 + $0xc8] sm:$0xff]  ;;  %132 = vmatpush.msra.mxu0 %v108_v6 }
  0x16   :  { %173 = vmatpush.msra.mxu2 %v102_v2  ;;  %193 = vmatpush.msra.mxu3 %v103_v3  ;;  %v86_v8 = vld [vmem:[#allocation7 + $0x10] sm:$0xff]  ;;  %v87_v9 = vld [vmem:[#allocation7 + $0x18] sm:$0xff]  ;;  %v100_v10 = vld [vmem:[#allocation7 + $0x80] sm:$0xff] }
  0x17   :  { %152 = vmatpush.msra.mxu1 %v109_v7  ;;  %v101_v11 = vld [vmem:[#allocation7 + $0x88] sm:$0xff]  ;;  %v83_v12 = vld [vmem:[#allocation5] sm:$0xff]  ;;  %v114_v13 = vld [vmem:[#allocation7 + $0xf0] sm:$0xff]  ;;  %133 = vmatpush.msra.mxu0 %v100_v10 }
  0x18   :  { %174 = vmatpush.msra.mxu2 %v94_v4  ;;  %194 = vmatpush.msra.mxu3 %v95_v5  ;;  %v115_v14 = vld [vmem:[#allocation7 + $0xf8] sm:$0xff]  ;;  %v92_v15 = vld [vmem:[#allocation7 + $0x40] sm:$0xff]  ;;  %v93_v16 = vld [vmem:[#allocation7 + $0x48] sm:$0xff] }
  0x19   :  { %153 = vmatpush.msra.mxu1 %v101_v11  ;;  %v106_v17 = vld [vmem:[#allocation7 + $0xb0] sm:$0xff]  ;;  %v107_v18 = vld [vmem:[#allocation7 + $0xb8] sm:$0xff]  ;;  %v84_v19 = vld [vmem:[#allocation7] sm:$0xff]  ;;  %134 = vmatpush.msra.mxu0 %v92_v15 }
  0x1a   :  { %175 = vmatpush.msra.mxu2 %v86_v8  ;;  %195 = vmatpush.msra.mxu3 %v87_v9  ;;  %v85_v20 = vld [vmem:[#allocation7 + $0x8] sm:$0xff]  ;;  %v98_v21 = vld [vmem:[#allocation7 + $0x70] sm:$0xff]  ;;  %v99_v22 = vld [vmem:[#allocation7 + $0x78] sm:$0xff] }
  0x1b   :  { %343 = vmatmul.msk.f32.vlgmr.msra.gmra.mxu2 %vm116_vm0, %v83_v12  ;;  %344 = vmatmul.msk.f32.vlgmr.msra.gmra.mxu3 %vm116_vm0, %v83_v12  ;;  %v112_v23 = vld [vmem:[#allocation7 + $0xe0] sm:$0xff]  ;;  %v113_v24 = vld [vmem:[#allocation7 + $0xe8] sm:$0xff]  ;;  %v90_v25 = vld [vmem:[#allocation7 + $0x30] sm:$0xff] }
  0x1c   :  { %252 = vmatpush.msrb.mxu2 %v114_v13  ;;  %272 = vmatpush.msrb.mxu3 %v115_v14  ;;  %v91_v26 = vld [vmem:[#allocation7 + $0x38] sm:$0xff]  ;;  %v104_v27 = vld [vmem:[#allocation7 + $0xa0] sm:$0xff]  ;;  %v105_v28 = vld [vmem:[#allocation7 + $0xa8] sm:$0xff] }
  0x1d   :  { %154 = vmatpush.msra.mxu1 %v93_v16  ;;  %135 = vmatpush.msra.mxu0 %v84_v19  ;;  %v96_v29 = vld [vmem:[#allocation7 + $0x60] sm:$0xff]  ;;  %v97_v30 = vld [vmem:[#allocation7 + $0x68] sm:$0xff]  ;;  %v75_v36 = vld [vmem:[#allocation2] sm:$0xff] }
  0x1e   :  { %253 = vmatpush.msrb.mxu2 %v106_v17  ;;  %273 = vmatpush.msrb.mxu3 %v107_v18  ;;  %v88_v31 = vld [vmem:[#allocation7 + $0x20] sm:$0xff]  ;;  %v89_v32 = vld [vmem:[#allocation7 + $0x28] sm:$0xff]  ;;  %v78_v43 = vld [vmem:[#allocation2 + $0x18] sm:$0xff] }
  0x1f   :  { %155 = vmatpush.msra.mxu1 %v85_v20  ;;  %341 = vmatmul.msk.f32.vlgmr.msra.gmra.mxu0 %vm116_vm0, %v83_v12  ;;  %v288_v33 = vld [vmem:[#allocation8] sm:$0xff]  ;;  %v77_v42 = vld [vmem:[#allocation2 + $0x10] sm:$0xff]  ;;  %v79_v52 = vld [vmem:[#allocation2 + $0x20] sm:$0xff] }
  0x20   :  { %254 = vmatpush.msrb.mxu2 %v98_v21  ;;  %274 = vmatpush.msrb.mxu3 %v99_v22  ;;  %v290_v34 = vperm.slane %v288_v33, 0  ;;  %v291_v35 = vperm.slane %v288_v33, 1  ;;  %v76_v37 = vld [vmem:[#allocation2 + $0x8] sm:$0xff]  ;;  %v292_v38 = vperm.slane %v288_v33, 2  ;;  %v293_v39 = vperm.slane %v288_v33, 3  ;;  %v81_v58 = vld [vmem:[#allocation2 + $0x30] sm:$0xff] }
  0x21   :  { %342 = vmatmul.msk.f32.vlgmr.msra.gmra.mxu1 %vm116_vm0, %v83_v12  ;;  %212 = vmatpush.msrb.mxu0 %v112_v23  ;;  %v294_v50 = vperm.slane %v288_v33, 4  ;;  %v295_v51 = vperm.slane %v288_v33, 5  ;;  %v80_v53 = vld [vmem:[#allocation2 + $0x28] sm:$0xff]  ;;  %v296_v56 = vperm.slane %v288_v33, 6  ;;  %v297_v57 = vperm.slane %v288_v33, 7  ;;  %v82_v59 = vld [vmem:[#allocation2 + $0x38] sm:$0xff] }
  0x22   :  { %232 = vmatpush.msrb.mxu1 %v113_v24  ;;  %255 = vmatpush.msrb.mxu2 %v90_v25 }
  0x23   :  { %275 = vmatpush.msrb.mxu3 %v91_v26  ;;  %213 = vmatpush.msrb.mxu0 %v104_v27 }
  0x24   :  { %233 = vmatpush.msrb.mxu1 %v105_v28  ;;  %347 = vmatmul.msk.f32.vlgmr.msrb.gmra.mxu2 %vm116_vm0, %v83_v12 }
  0x25   :  { %348 = vmatmul.msk.f32.vlgmr.msrb.gmra.mxu3 %vm116_vm0, %v83_v12  ;;  %214 = vmatpush.msrb.mxu0 %v96_v29 }
  0x26   :  { %234 = vmatpush.msrb.mxu1 %v97_v30 }
  0x27   :  { %215 = vmatpush.msrb.mxu0 %v88_v31 }
  0x28   :  { %235 = vmatpush.msrb.mxu1 %v89_v32  ;;  %345 = vmatmul.msk.f32.vlgmr.msrb.gmra.mxu0 %vm116_vm0, %v83_v12 }
  0x29   :  { %346 = vmatmul.msk.f32.vlgmr.msrb.gmra.mxu1 %vm116_vm0, %v83_v12 }
  0x9c   :  { %v137_v40 = vpop.f32.mrf.mxu0 }
  0x9d   :  { %vm280_vm1 = vcmp.gt.f32.partialorder %v137_v40, 0.5 }
  0x9e   :  { %v157_v41 = vpop.f32.mrf.mxu1  ;;  %v177_v44 = vpop.f32.mrf.mxu2  ;;  %v306_v46 = vsel %vm280_vm1, %v290_v34, %v75_v36 }
  0x9f   :  { %vm281_vm2 = vcmp.gt.f32.partialorder %v157_v41, 0.5  ;;  %v197_v45 = vpop.f32.mrf.mxu3  ;;  %vm282_vm3 = vcmp.gt.f32.partialorder %v177_v44, 0.5  ;;  %314 = vst [vmem:[#allocation10] sm:$0xff] %v306_v46 }
  0xa0   :  { %v307_v47 = vsel %vm281_vm2, %v291_v35, %v76_v37  ;;  %vm283_vm4 = vcmp.gt.f32.partialorder %v197_v45, 0.5  ;;  %v308_v48 = vsel %vm282_vm3, %v292_v38, %v77_v42 }
  0xa1   :  { %v309_v49 = vsel %vm283_vm4, %v293_v39, %v78_v43  ;;  %315 = vst [vmem:[#allocation10 + $0x8] sm:$0xff] %v307_v47 }
  0xa2   :  { %316 = vst [vmem:[#allocation10 + $0x10] sm:$0xff] %v308_v48 }
  0xa3   :  { %317 = vst [vmem:[#allocation10 + $0x18] sm:$0xff] %v309_v49 }
  0xa5   :  { %v217_v54 = vpop.f32.mrf.mxu0 }
  0xa6   :  { %v237_v55 = vpop.f32.mrf.mxu1  ;;  %vm284_vm5 = vcmp.gt.f32.partialorder %v217_v54, 0.5 }
  0xa7   :  { %vm285_vm6 = vcmp.gt.f32.partialorder %v237_v55, 0.5  ;;  %v310_v60 = vsel %vm284_vm5, %v294_v50, %v79_v52  ;;  %v257_v62 = vpop.f32.mrf.mxu2 }
  0xa8   :  { %v311_v61 = vsel %vm285_vm6, %v295_v51, %v80_v53  ;;  %v277_v63 = vpop.f32.mrf.mxu3  ;;  %318 = vst [vmem:[#allocation10 + $0x20] sm:$0xff] %v310_v60  ;;  %vm286_vm7 = vcmp.gt.f32.partialorder %v257_v62, 0.5 }
  0xa9   :  { %vm287_vm8 = vcmp.gt.f32.partialorder %v277_v63, 0.5  ;;  %319 = vst [vmem:[#allocation10 + $0x28] sm:$0xff] %v311_v61  ;;  %v312_v0 = vsel %vm286_vm7, %v296_v56, %v81_v58 }
  0xaa   :  { %v313_v1 = vsel %vm287_vm8, %v297_v57, %v82_v59  ;;  %320 = vst [vmem:[#allocation10 + $0x30] sm:$0xff] %v312_v0 }
  0xab   :  { %321 = vst [vmem:[#allocation10 + $0x38] sm:$0xff] %v313_v1 }
  0xac   :  { %332 = dma.vmem_to_hbm [thread:$0]  %s328_s3, 1024, %s330_s11, [#allocation4]  }
  0xad   :  { %482 = dma.done.wait [#allocation4], 1024  }
  0xae   :  { %483 = vsyncadd [#allocation4], 4294966272 }
  0xaf   :  { %337 = vsyncpa [#allocation3], 1 }
  0xb0   :  { %338 = vsyncpa [#allocation6], 1 }
  0xb1   :  { %339 = vsyncpa [#allocation9], 1 }
  0xb2   :  { %340 = vsyncpa [#allocation4], 1 }

</bundles_post_ra>
